<compile_context>
chip_gen: v5e
topology: v5e:2x2
jax: 0.10.0
libtpu: 0.0.40
codegen_flags: <defaults>
</compile_context>

<pallas_src>
import math
from functools import partial

import numpy as np
import jax
import jax.numpy as jnp
from jax.experimental import pallas as pl
from jax.experimental.pallas import tpu as pltpu

_LANE = 128
_SUBLANE = 8


def _round_up(x: int, m: int) -> int:
    return ((x + m - 1) // m) * m


def _pad2d(a, rows, cols):
    r, c = a.shape
    if r == rows and c == cols:
        return a
    return jnp.pad(a, ((0, rows - r), (0, cols - c)))


# ---------------------------------------------------------------------------
# Pallas kernel: fused [Linear + ReLU] * n_layers  ->  Linear head
# ---------------------------------------------------------------------------
def _make_mlp_kernel(n_layers: int):
    def kernel(x_ref, *refs):
        # refs = (w0, b0, w1, b1, ..., w_head, b_head, out_ref)
        out_ref = refs[-1]
        h = x_ref[...].astype(jnp.float32)
        for i in range(n_layers):
            w = refs[2 * i][...]          # bf16 (d_prev_p, d_hid_p)
            b = refs[2 * i + 1][...]      # f32  (1, d_hid_p)
            h = jnp.dot(h.astype(jnp.bfloat16), w,
                        preferred_element_type=jnp.float32) + b
            h = jnp.maximum(h, 0.0)       # ReLU; dropout(training=False) = id
        w_h = refs[2 * n_layers][...]
        b_h = refs[2 * n_layers + 1][...]
        out = jnp.dot(h.astype(jnp.bfloat16), w_h,
                      preferred_element_type=jnp.float32) + b_h
        out_ref[...] = out.astype(out_ref.dtype)

    return kernel


def mlp_pallas_forward(x_in, layer_params, head_params, *, tile_b=256):
    """x_in: (B, d_in) f32.  layer_params: list of (W(in,out), b(1,out)) f32.
    head_params: (W(in,out), b(1,out)) f32.  Returns (B, d_out) f32."""
    B, d_in = x_in.shape
    d_out = head_params[0].shape[1]
    n_layers = len(layer_params)

    # ---- batch tiling: big tiles, padded batch (no divisibility assert) ----
    tile_b = max(_SUBLANE, min(tile_b, _round_up(B, _SUBLANE)))
    # v7x has 2 TensorCores: if the whole batch fits one big tile, split it so
    # the parallel grid has >= 2 steps (only when tiles stay >= 128 rows).
    if _round_up(B, tile_b) // tile_b < 2 and tile_b >= 2 * _LANE:
        tile_b = _round_up(tile_b // 2, _SUBLANE)
    Bp = _round_up(B, tile_b)

    # ---- lane-dense padding of all feature dims ----
    d_in_p = _round_up(d_in, _LANE)
    d_out_p = _round_up(d_out, _LANE)

    flat_params = []
    prev = d_in_p
    for w, b in layer_params:
        dp = _round_up(w.shape[1], _LANE)
        flat_params.append(_pad2d(w, prev, dp).astype(jnp.bfloat16))
        flat_params.append(_pad2d(b, 1, dp).astype(jnp.float32))
        prev = dp
    w_h, b_h = head_params
    flat_params.append(_pad2d(w_h, prev, d_out_p).astype(jnp.bfloat16))
    flat_params.append(_pad2d(b_h, 1, d_out_p).astype(jnp.float32))

    x_p = jnp.pad(x_in.astype(jnp.float32),
                  ((0, Bp - B), (0, d_in_p - d_in)))

    in_specs = [pl.BlockSpec((tile_b, d_in_p), lambda i: (i, 0))]
    for p in flat_params:
        # Whole-array block + constant index_map: block index never changes,
        # so Pallas keeps the parameters resident and skips per-tile re-DMA.
        in_specs.append(pl.BlockSpec(p.shape, lambda i: (0, 0)))
    out_spec = pl.BlockSpec((tile_b, d_out_p), lambda i: (i, 0))

    # ---- explicit VMEM budget (params default-double-buffered + I/O tiles) ----
    param_bytes = sum(int(np.prod(p.shape)) * p.dtype.itemsize
                      for p in flat_params)
    io_bytes = 2 * tile_b * (d_in_p + d_out_p) * 4        # double-buffered x/out
    vmem_bytes = int(min(64 * 1024 * 1024,
                         max(32 * 1024 * 1024,
                             2 * param_bytes + io_bytes + (4 << 20))))
    # TODO(synk): if 2*param_bytes approaches v7x's 64 MiB VMEM (very wide/deep
    # configs), stream weights per layer (extra grid axis / pltpu.emit_pipeline)
    # instead of keeping the whole parameter set resident.

    out_p = pl.pallas_call(
        _make_mlp_kernel(n_layers),
        out_shape=jax.ShapeDtypeStruct((Bp, d_out_p), jnp.float32),
        grid_spec=pltpu.PrefetchScalarGridSpec(
            num_scalar_prefetch=0,
            grid=(Bp // tile_b,),
            in_specs=in_specs,
            out_specs=out_spec,
        ),
        compiler_params=pltpu.CompilerParams(
            dimension_semantics=("parallel",),
            vmem_limit_bytes=vmem_bytes,
        ),
    )(x_p, *flat_params)

    return out_p[:B, :d_out]


# ---------------------------------------------------------------------------
# Parameter construction (deterministic, matches module __init__ shapes).
# Linear weights are stored transposed vs PyTorch: (in_features, out_features).
# ---------------------------------------------------------------------------
def init_mlp_params(key, *, d_numerical, n_layers, d_layers, d_out,
                    categories, d_embedding):
    d_in = d_numerical
    params = {}
    if categories is not None:
        d_in += len(categories) * d_embedding
        params["category_offsets"] = jnp.cumsum(
            jnp.array([0] + list(categories[:-1]), dtype=jnp.int32))
        key, k = jax.random.split(key)
        # kaiming_uniform_(a=sqrt(5)) on Embedding weight -> bound = 1/sqrt(fan_in)
        bound = 1.0 / math.sqrt(d_embedding)
        params["emb_weight"] = jax.random.uniform(
            k, (sum(categories), d_embedding), jnp.float32, -bound, bound)

    dims = [d_in] + [d_layers] * n_layers
    layers = []
    for i in range(n_layers):
        bound = 1.0 / math.sqrt(dims[i])
        key, kw, kb = jax.random.split(key, 3)
        w = jax.random.uniform(kw, (dims[i], dims[i + 1]), jnp.float32, -bound, bound)
        b = jax.random.uniform(kb, (1, dims[i + 1]), jnp.float32, -bound, bound)
        layers.append((w, b))
    params["layers"] = layers

    bound = 1.0 / math.sqrt(dims[-1])
    key, kw, kb = jax.random.split(key, 3)
    params["head"] = (
        jax.random.uniform(kw, (dims[-1], d_out), jnp.float32, -bound, bound),
        jax.random.uniform(kb, (1, d_out), jnp.float32, -bound, bound),
    )
    return params


# ---------------------------------------------------------------------------
# Glue: numerical/categorical split + embedding (plain JAX), then Pallas MLP.
# ---------------------------------------------------------------------------
def build_features(x, params, categorical_indicator):
    cat_ind = np.asarray(categorical_indicator, dtype=bool)   # static decision (jit-safe)
    if cat_ind.any():
        num_idx = np.nonzero(~cat_ind)[0]
        cat_idx = np.nonzero(cat_ind)[0]
        x_num = x[:, num_idx].astype(jnp.float32)
        x_cat = x[:, cat_idx].astype(jnp.int32)
        emb = params["emb_weight"][x_cat + params["category_offsets"][None]]
        emb = emb.reshape(x_cat.shape[0], -1)
        return jnp.concatenate([x_num, emb], axis=-1)
    return x.astype(jnp.float32)


def mlp_forward(x, params, categorical_indicator, *, regression):
    x_in = build_features(x, params, categorical_indicator)
    out = mlp_pallas_forward(x_in, params["layers"], params["head"])
    if not regression and out.shape[-1] == 1:
        out = jnp.squeeze(out, axis=-1)
    return out


def mlp_reference(x_in, layer_params, head_params):
    h = x_in.astype(jnp.float32)
    for w, b in layer_params:
        h = jnp.maximum(h @ w + b, 0.0)
    w, b = head_params
    return h @ w + b


# ---------------------------------------------------------------------------
if __name__ == "__main__":
    # Small, module-consistent config.
    d_numerical = 4
    categories = [3, 5]          # two categorical features
    d_embedding = 4
    n_layers = 2
    d_layers = 32
    d_out = 1
    regression = False
    batch = 16

    # last len(categories) columns are categorical
    categorical_indicator = tuple([False] * d_numerical + [True] * len(categories))

    key = jax.random.PRNGKey(0)
    key, kp, kx, kc = jax.random.split(key, 4)
    params = init_mlp_params(
        kp, d_numerical=d_numerical, n_layers=n_layers, d_layers=d_layers,
        d_out=d_out, categories=categories, d_embedding=d_embedding)

    x_num = jax.random.normal(kx, (batch, d_numerical), jnp.float32)
    x_cat = jnp.stack(
        [jax.random.randint(jax.random.fold_in(kc, i), (batch,), 0, c)
         for i, c in enumerate(categories)], axis=-1).astype(jnp.float32)
    x = jnp.concatenate([x_num, x_cat], axis=-1)   # (batch, n_features)

    # Jit the whole forward so embedding gather, padding, pallas_call and
    # slicing fuse into one dispatch (categorical_indicator / regression are
    # bound statically via partial).
    fwd = jax.jit(partial(mlp_forward,
                          categorical_indicator=categorical_indicator,
                          regression=regression))
    out = fwd(x, params)
    jax.block_until_ready(out)
    assert out.shape == (batch,), out.shape

    # Correctness vs pure-JAX f32 reference (bf16 matmul inputs -> loose tol).
    x_in = build_features(x, params, categorical_indicator)
    ref = jnp.squeeze(mlp_reference(x_in, params["layers"], params["head"]), -1)
    np.testing.assert_allclose(np.asarray(out), np.asarray(ref),
                               rtol=3e-2, atol=3e-2)

    print("KERNEL_OK")
</pallas_src>

<mosaic_0001>
module attributes {stable_mosaic.version = 11 : i64} {
  func.func @kernel(%arg0: i32, %arg1: memref<16x128xf32, #tpu.memory_space<vmem>>, %arg2: memref<128x128xbf16, #tpu.memory_space<vmem>>, %arg3: memref<1x128xf32, #tpu.memory_space<vmem>>, %arg4: memref<128x128xbf16, #tpu.memory_space<vmem>>, %arg5: memref<1x128xf32, #tpu.memory_space<vmem>>, %arg6: memref<128x128xbf16, #tpu.memory_space<vmem>>, %arg7: memref<1x128xf32, #tpu.memory_space<vmem>>, %arg8: memref<16x128xf32, #tpu.memory_space<vmem>>) attributes {dimension_semantics = [#tpu.dimension_semantics<parallel>], iteration_bounds = array<i64: 1>, scalar_prefetch = 0 : i64, scratch_operands = 0 : i64, tpu.core_type = #tpu.core_type<tc>, window_params = [{transform_indices = @transform_0, window_bounds = array<i64: 16, 128>}, {pipeline_mode = #tpu.pipeline_mode<synchronous>, transform_indices = @transform_1, window_bounds = array<i64: 128, 128>}, {pipeline_mode = #tpu.pipeline_mode<synchronous>, transform_indices = @transform_2, window_bounds = array<i64: 1, 128>}, {pipeline_mode = #tpu.pipeline_mode<synchronous>, transform_indices = @transform_3, window_bounds = array<i64: 128, 128>}, {pipeline_mode = #tpu.pipeline_mode<synchronous>, transform_indices = @transform_4, window_bounds = array<i64: 1, 128>}, {pipeline_mode = #tpu.pipeline_mode<synchronous>, transform_indices = @transform_5, window_bounds = array<i64: 128, 128>}, {pipeline_mode = #tpu.pipeline_mode<synchronous>, transform_indices = @transform_6, window_bounds = array<i64: 1, 128>}, {transform_indices = @transform_7, window_bounds = array<i64: 16, 128>}]} {
    %c0 = arith.constant 0 : index
    %c0_0 = arith.constant 0 : index
    %0 = vector.load %arg1[%c0, %c0_0] : memref<16x128xf32, #tpu.memory_space<vmem>>, vector<16x128xf32>
    %c0_1 = arith.constant 0 : index
    %c0_2 = arith.constant 0 : index
    %1 = vector.load %arg2[%c0_1, %c0_2] : memref<128x128xbf16, #tpu.memory_space<vmem>>, vector<128x128xbf16>
    %c0_3 = arith.constant 0 : index
    %c0_4 = arith.constant 0 : index
    %2 = vector.load %arg3[%c0_3, %c0_4] : memref<1x128xf32, #tpu.memory_space<vmem>>, vector<1x128xf32>
    %3 = arith.truncf %0 : vector<16x128xf32> to vector<16x128xbf16>
    %cst = arith.constant dense<0.000000e+00> : vector<16x128xf32>
    %4 = tpu.matmul %3, %1, %cst {dimension_numbers = #tpu.dot_dimension_numbers<[1], [0], [0], [1], [0, 0, 1, 1], [], []>} : vector<16x128xbf16>, vector<128x128xbf16>, vector<16x128xf32> -> vector<16x128xf32>
    %5 = vector.broadcast %2 : vector<1x128xf32> to vector<16x128xf32>
    %6 = arith.addf %4, %5 : vector<16x128xf32>
    %cst_5 = arith.constant 0.000000e+00 : f32
    %7 = vector.broadcast %cst_5 : f32 to vector<16x128xf32>
    %8 = arith.maximumf %6, %7 : vector<16x128xf32>
    %c0_6 = arith.constant 0 : index
    %c0_7 = arith.constant 0 : index
    %9 = vector.load %arg4[%c0_6, %c0_7] : memref<128x128xbf16, #tpu.memory_space<vmem>>, vector<128x128xbf16>
    %c0_8 = arith.constant 0 : index
    %c0_9 = arith.constant 0 : index
    %10 = vector.load %arg5[%c0_8, %c0_9] : memref<1x128xf32, #tpu.memory_space<vmem>>, vector<1x128xf32>
    %11 = arith.truncf %8 : vector<16x128xf32> to vector<16x128xbf16>
    %cst_10 = arith.constant dense<0.000000e+00> : vector<16x128xf32>
    %12 = tpu.matmul %11, %9, %cst_10 {dimension_numbers = #tpu.dot_dimension_numbers<[1], [0], [0], [1], [0, 0, 1, 1], [], []>} : vector<16x128xbf16>, vector<128x128xbf16>, vector<16x128xf32> -> vector<16x128xf32>
    %13 = vector.broadcast %10 : vector<1x128xf32> to vector<16x128xf32>
    %14 = arith.addf %12, %13 : vector<16x128xf32>
    %cst_11 = arith.constant 0.000000e+00 : f32
    %15 = vector.broadcast %cst_11 : f32 to vector<16x128xf32>
    %16 = arith.maximumf %14, %15 : vector<16x128xf32>
    %c0_12 = arith.constant 0 : index
    %c0_13 = arith.constant 0 : index
    %17 = vector.load %arg6[%c0_12, %c0_13] : memref<128x128xbf16, #tpu.memory_space<vmem>>, vector<128x128xbf16>
    %c0_14 = arith.constant 0 : index
    %c0_15 = arith.constant 0 : index
    %18 = vector.load %arg7[%c0_14, %c0_15] : memref<1x128xf32, #tpu.memory_space<vmem>>, vector<1x128xf32>
    %19 = arith.truncf %16 : vector<16x128xf32> to vector<16x128xbf16>
    %cst_16 = arith.constant dense<0.000000e+00> : vector<16x128xf32>
    %20 = tpu.matmul %19, %17, %cst_16 {dimension_numbers = #tpu.dot_dimension_numbers<[1], [0], [0], [1], [0, 0, 1, 1], [], []>} : vector<16x128xbf16>, vector<128x128xbf16>, vector<16x128xf32> -> vector<16x128xf32>
    %21 = vector.broadcast %18 : vector<1x128xf32> to vector<16x128xf32>
    %22 = arith.addf %20, %21 : vector<16x128xf32>
    %c0_17 = arith.constant 0 : index
    %c0_18 = arith.constant 0 : index
    %23 = vector.load %arg8[%c0_17, %c0_18] : memref<16x128xf32, #tpu.memory_space<vmem>>, vector<16x128xf32>
    tpu.vector_store %arg8[%c0_17, %c0_18], %22 {strides = array<i32>} : memref<16x128xf32, #tpu.memory_space<vmem>>, vector<16x128xf32>,
    return
  }
  func.func @transform_0(%arg0: i32) -> (i32, i32) {
    %c0_i32 = arith.constant 0 : i32
    %c0_i32_0 = arith.constant 0 : i32
    return %arg0, %c0_i32 : i32, i32
  }
  func.func @transform_1(%arg0: i32) -> (i32, i32) {
    %c0_i32 = arith.constant 0 : i32
    %c0_i32_0 = arith.constant 0 : i32
    %c0_i32_1 = arith.constant 0 : i32
    return %c0_i32, %c0_i32_0 : i32, i32
  }
  func.func @transform_2(%arg0: i32) -> (i32, i32) {
    %c0_i32 = arith.constant 0 : i32
    %c0_i32_0 = arith.constant 0 : i32
    %c0_i32_1 = arith.constant 0 : i32
    return %c0_i32, %c0_i32_0 : i32, i32
  }
  func.func @transform_3(%arg0: i32) -> (i32, i32) {
    %c0_i32 = arith.constant 0 : i32
    %c0_i32_0 = arith.constant 0 : i32
    %c0_i32_1 = arith.constant 0 : i32
    return %c0_i32, %c0_i32_0 : i32, i32
  }
  func.func @transform_4(%arg0: i32) -> (i32, i32) {
    %c0_i32 = arith.constant 0 : i32
    %c0_i32_0 = arith.constant 0 : i32
    %c0_i32_1 = arith.constant 0 : i32
    return %c0_i32, %c0_i32_0 : i32, i32
  }
  func.func @transform_5(%arg0: i32) -> (i32, i32) {
    %c0_i32 = arith.constant 0 : i32
    %c0_i32_0 = arith.constant 0 : i32
    %c0_i32_1 = arith.constant 0 : i32
    return %c0_i32, %c0_i32_0 : i32, i32
  }
  func.func @transform_6(%arg0: i32) -> (i32, i32) {
    %c0_i32 = arith.constant 0 : i32
    %c0_i32_0 = arith.constant 0 : i32
    %c0_i32_1 = arith.constant 0 : i32
    return %c0_i32, %c0_i32_0 : i32, i32
  }
  func.func @transform_7(%arg0: i32) -> (i32, i32) {
    %c0_i32 = arith.constant 0 : i32
    %c0_i32_0 = arith.constant 0 : i32
    return %arg0, %c0_i32 : i32, i32
  }
}

</mosaic_0001>

<bundles_post_ra>
// kernel: mlp_forward.1
= control target key start
LH: loop header
LB: loop body
LE: loop exit
PB: predicated region body
PF: predicated region fallthrough
CT: control target
= control target key end

     0   :  { %s543_s1 = inlined_call_operand.vmem [shape: bf16[128,128], index: 1, kind: input, shape index: {}]   ;;  %s544_s3 = inlined_call_operand.vmem [shape: bf16[128,128], index: 3, kind: input, shape index: {}]   ;;  %s545_s2 = inlined_call_operand.vmem [shape: f32[1,128], index: 2, kind: input, shape index: {}]   ;;  %s546_s0 = inlined_call_operand.vmem [shape: f32[16,128], index: 0, kind: input, shape index: {}]   ;;  %s547_s4 = inlined_call_operand.vmem [shape: f32[1,128], index: 4, kind: input, shape index: {}]   ;;  %s548_s5 = inlined_call_operand.vmem [shape: bf16[128,128], index: 5, kind: input, shape index: {}]   ;;  %s549_s6 = inlined_call_operand.vmem [shape: f32[1,128], index: 6, kind: input, shape index: {}]   ;;  %s550_s7 = inlined_call_operand.vmem [shape: f32[16,128], index: 7, kind: output, shape index: {}]  }
   0x1   :  { %v390_v0 = vld [vmem:[%s543_s1 + $0x38] sm:$0xff]  ;;  %v389_v1 = vld [vmem:[%s543_s1 + $0x30] sm:$0xff]  ;;  %v388_v4 = vld [vmem:[%s543_s1 + $0x28] sm:$0xff] }
   0x2   :  { %97 = vmatpush.bf16.msra.mxu0 %v390_v0  ;;  %v398_v2 = vld [vmem:[%s544_s3 + $0x38] sm:$0xff]  ;;  %v397_v3 = vld [vmem:[%s544_s3 + $0x30] sm:$0xff]  ;;  %v396_v5 = vld [vmem:[%s544_s3 + $0x28] sm:$0xff] }
   0x3   :  { %182 = vmatpush.bf16.msra.mxu1 %v398_v2  ;;  %v387_v6 = vld [vmem:[%s543_s1 + $0x20] sm:$0xff]  ;;  %v386_v8 = vld [vmem:[%s543_s1 + $0x18] sm:$0xff]  ;;  %v385_v9 = vld [vmem:[%s543_s1 + $0x10] sm:$0xff] }
   0x4   :  { %v395_v7 = vld [vmem:[%s544_s3 + $0x20] sm:$0xff]  ;;  %v384_v10 = vld [vmem:[%s543_s1 + $0x8] sm:$0xff]  ;;  %v394_v15 = vld [vmem:[%s544_s3 + $0x18] sm:$0xff] }
   0x5   :  { %v383_v11 = vld [vmem:[%s543_s1] sm:$0xff]  ;;  %v27_v13 = vld [vmem:[%s546_s0 + $0x8] sm:$0xff]  ;;  %v393_v16 = vld [vmem:[%s544_s3 + $0x10] sm:$0xff] }
   0x6   :  { %98 = vmatpush.bf16.msra.mxu0 %v389_v1  ;;  %v26_v12 = vld [vmem:[%s546_s0] sm:$0xff]  ;;  %v392_v17 = vld [vmem:[%s544_s3 + $0x8] sm:$0xff]  ;;  %v406_v19 = vld [vmem:[%s548_s5 + $0x38] sm:$0xff] }
   0x7   :  { %183 = vmatpush.bf16.msra.mxu1 %v397_v3  ;;  %v45_v14 = vpack.c.bf16 %v27_v13, %v26_v12  ;;  %v391_v18 = vld [vmem:[%s544_s3] sm:$0xff]  ;;  %267 = vmatpush.bf16.msra.mxu2 %v406_v19  ;;  %v405_v20 = vld [vmem:[%s548_s5 + $0x30] sm:$0xff]  ;;  %v404_v21 = vld [vmem:[%s548_s5 + $0x28] sm:$0xff] }
   0x8   :  { %v403_v22 = vld [vmem:[%s548_s5 + $0x20] sm:$0xff]  ;;  %v402_v31 = vld [vmem:[%s548_s5 + $0x18] sm:$0xff]  ;;  %v401_v32 = vld [vmem:[%s548_s5 + $0x10] sm:$0xff] }
   0x9   :  { %v407_v24 = vld [vmem:[%s545_s2] ss:$0 sm:$0xff]  ;;  %v400_v33 = vld [vmem:[%s548_s5 + $0x8] sm:$0xff] }
   0xa   :  { %99 = vmatpush.bf16.msra.mxu0 %v388_v4  ;;  %v399_v34 = vld [vmem:[%s548_s5] sm:$0xff] }
   0xb   :  { %184 = vmatpush.bf16.msra.mxu1 %v396_v5  ;;  %268 = vmatpush.bf16.msra.mxu2 %v405_v20  ;;  %v408_v36 = vld [vmem:[%s547_s4] ss:$0 sm:$0xff] }
   0xc   :  { %v409_v43 = vld [vmem:[%s549_s6] ss:$0 sm:$0xff] }
   0xe   :  { %100 = vmatpush.bf16.msra.mxu0 %v387_v6 }
   0xf   :  { %185 = vmatpush.bf16.msra.mxu1 %v395_v7  ;;  %269 = vmatpush.bf16.msra.mxu2 %v404_v21 }
  0x12   :  { %101 = vmatpush.bf16.msra.mxu0 %v386_v8 }
  0x13   :  { %186 = vmatpush.bf16.msra.mxu1 %v394_v15  ;;  %270 = vmatpush.bf16.msra.mxu2 %v403_v22 }
  0x16   :  { %102 = vmatpush.bf16.msra.mxu0 %v385_v9 }
  0x17   :  { %187 = vmatpush.bf16.msra.mxu1 %v393_v16  ;;  %271 = vmatpush.bf16.msra.mxu2 %v402_v31 }
  0x1a   :  { %103 = vmatpush.bf16.msra.mxu0 %v384_v10 }
  0x1b   :  { %188 = vmatpush.bf16.msra.mxu1 %v392_v17  ;;  %272 = vmatpush.bf16.msra.mxu2 %v401_v32 }
  0x1e   :  { %104 = vmatpush.bf16.msra.mxu0 %v383_v11 }
  0x1f   :  { %189 = vmatpush.bf16.msra.mxu1 %v391_v18  ;;  %273 = vmatpush.bf16.msra.mxu2 %v400_v33 }
  0x21   :  { %105 = vmatmul.bf16.vlgmr.msra.gmra.mxu0 %v45_v14 }
  0x23   :  { %274 = vmatpush.bf16.msra.mxu2 %v399_v34 }
  0x9e   :  { %v106_v23 = vpop.f32.mrf.mxu0 }
  0x9f   :  { %v107_v25 = vadd.f32 %v407_v24, %v106_v23 }
  0xa1   :  { %v111_v28 = vmax.f32 %v107_v25, 0.0 }
  0xa6   :  { %v108_v26 = vpop.f32.mrf.mxu0 }
  0xa7   :  { %v109_v27 = vadd.f32 %v407_v24, %v108_v26 }
  0xa9   :  { %v112_v29 = vmax.f32 %v109_v27, 0.0 }
  0xab   :  { %v130_v30 = vpack.c.bf16 %v112_v29, %v111_v28 }
  0xad   :  { %190 = vmatmul.bf16.vlgmr.msra.gmra.mxu1 %v130_v30 }
 0x12a   :  { %v191_v35 = vpop.f32.mrf.mxu1 }
 0x12b   :  { %v192_v37 = vadd.f32 %v408_v36, %v191_v35 }
 0x12d   :  { %v196_v40 = vmax.f32 %v192_v37, 0.0 }
 0x132   :  { %v193_v38 = vpop.f32.mrf.mxu1 }
 0x133   :  { %v194_v39 = vadd.f32 %v408_v36, %v193_v38 }
 0x135   :  { %v197_v41 = vmax.f32 %v194_v39, 0.0 }
 0x137   :  { %v215_v42 = vpack.c.bf16 %v197_v41, %v196_v40 }
 0x139   :  { %275 = vmatmul.bf16.vlgmr.msra.gmra.mxu2 %v215_v42 }
 0x1bc   :  { %v276_v44 = vpop.f32.mrf.mxu2 }
 0x1bd   :  { %v277_v45 = vadd.f32 %v409_v43, %v276_v44 }
 0x1bf   :  { %281 = vst [vmem:[%s550_s7] sm:$0xff] %v277_v45 }
 0x1c4   :  { %v278_v46 = vpop.f32.mrf.mxu2 }
 0x1c5   :  { %v279_v47 = vadd.f32 %v409_v43, %v278_v46 }
 0x1c7   :  { %282 = vst [vmem:[%s550_s7 + $0x8] sm:$0xff] %v279_v47 }

</bundles_post_ra>
